<compile_context>
chip_gen: v7x
topology: tpu7x:2x2x1
jax: 0.10.0
libtpu: 0.0.40
codegen_flags: <defaults>
</compile_context>

<pallas_src>
import functools

import jax
import jax.numpy as jnp
from jax.experimental import pallas as pl
from jax.experimental.pallas import tpu as pltpu

_LANE = 128
_SUB = 8


def _chip_config():
    """Return (max_tile_rows, num_splits, vmem_limit_bytes) per TPU generation."""
    kind = ""
    try:
        kind = jax.devices()[0].device_kind.lower()
    except Exception:
        pass
    kind_c = kind.replace(" ", "")
    if "v7" in kind_c or "tpu7" in kind_c:
        # v7x: 2 TCs/chip, ~3.2 TB/s HBM, 64 MiB physical VMEM/TC.  4 MiB f32
        # blocks (3 inputs x 2 buffers = 24 MiB) amortize the ~0.35us/step grid
        # overhead; raise scoped VMEM to make room (still < 64 MiB physical).
        return 8192, 2, 48 * 1024 * 1024
    if "v6" in kind_c:
        # v6e: 1 TC, 32 MiB default scoped VMEM -> 2 MiB blocks fit w/o a raise.
        return 4096, 1, None
    if "v5e" in kind_c or "v5lite" in kind_c:
        # v5e: 1 TC, 16 MiB default scoped VMEM -> keep 1 MiB blocks.
        return 2048, 1, None
    # Unknown / other (v4, v5p, ...): conservative tile, allow a 2-way split.
    return 2048, 2, None


def _mask_loss_kernel(x_ref, y_ref, m_ref, acc_ref, *,
                      rows, tile_rows, n_tiles, has_dup, ragged):
    s = pl.program_id(0)          # parallel split (TensorCore) index
    i = pl.program_id(1)          # sequential reduction step within the split
    steps = pl.num_programs(1)
    t = s * steps + i             # logical tile index

    @pl.when(i == 0)
    def _():
        acc_ref[...] = jnp.zeros_like(acc_ref)

    def accumulate(vals):
        # (tile_rows, 128) -> (8, 128) sublane fold: pure VPU adds into the
        # resident accumulator; the expensive XLU reduce is deferred to the
        # wrapper epilogue.
        acc_ref[...] += jnp.sum(
            vals.reshape(tile_rows // _SUB, _SUB, _LANE), axis=0)

    def body():
        x = x_ref[...].astype(jnp.float32)
        y = y_ref[...].astype(jnp.float32)
        am = m_ref[...].astype(jnp.float32)
        d = am * (x - y)
        d2 = d * d

        if ragged:
            # Only the final real tile can contain garbage (unspecified) rows
            # past `rows`; gate the iota/compare/select behind a scalar pl.when
            # so every interior tile skips it entirely.
            is_tail = (t + 1) * tile_rows > rows

            @pl.when(jnp.logical_not(is_tail))
            def _():
                accumulate(d2)

            @pl.when(is_tail)
            def _():
                row_ids = jax.lax.broadcasted_iota(
                    jnp.int32, (tile_rows, _LANE), 0)
                accumulate(jnp.where(t * tile_rows + row_ids < rows, d2, 0.0))
        else:
            accumulate(d2)

    if has_dup:
        # Clamped / duplicated tail tiles of the split: skip the whole body
        # (leave acc untouched) instead of computing a garbage tile and
        # zeroing it.
        @pl.when(t < n_tiles)
        def _():
            body()
    else:
        body()


def mask_loss(output, target, a_m):
    """sqrt(mean((a_m*output - a_m*target)**2)) via a Pallas TPU kernel."""
    assert output.shape == target.shape == a_m.shape
    n_elems = int(output.size)
    assert n_elems > 0

    max_tile_rows, cfg_splits, vmem_limit = _chip_config()

    xf = jnp.reshape(output, (-1,))
    yf = jnp.reshape(target, (-1,))
    mf = jnp.reshape(a_m, (-1,))

    rows = n_elems // _LANE              # complete 128-lane rows
    aligned = rows * _LANE
    tail = n_elems - aligned             # < 128 leftover elements

    total = jnp.float32(0.0)

    if rows > 0:
        def to_slab(v):
            if tail:
                v = v[:aligned]          # 128-aligned prefix (no pad copy)
            return jnp.reshape(v, (rows, _LANE))

        x2d, y2d, m2d = to_slab(xf), to_slab(yf), to_slab(mf)

        # Tile sizing: as large as the generation allows, multiple of 8 rows.
        tile_rows = min(max_tile_rows, pl.cdiv(rows, _SUB) * _SUB)
        n_tiles = pl.cdiv(rows, tile_rows)

        num_splits = cfg_splits if n_tiles >= 2 else 1
        steps = pl.cdiv(n_tiles, num_splits)

        has_dup = num_splits * steps > n_tiles   # clamped duplicate tail tiles
        ragged = n_tiles * tile_rows > rows      # garbage rows in last tile

        def in_index_map(s, i):
            # Clamp so duplicated tail tiles never index out-of-bounds blocks;
            # their contribution is skipped in-kernel via pl.when.
            return (jnp.minimum(s * steps + i, n_tiles - 1), 0)

        in_spec = pl.BlockSpec((tile_rows, _LANE), in_index_map)
        out_spec = pl.BlockSpec((None, _SUB, _LANE), lambda s, i: (s, 0, 0))

        kernel = functools.partial(
            _mask_loss_kernel, rows=rows, tile_rows=tile_rows,
            n_tiles=n_tiles, has_dup=has_dup, ragged=ragged)

        in_bytes = sum(int(v.size) * v.dtype.itemsize for v in (x2d, y2d, m2d))
        out_bytes = num_splits * _SUB * _LANE * 4
        cost = pl.CostEstimate(flops=4 * aligned, transcendentals=0,
                               bytes_accessed=in_bytes + out_bytes)

        partials = pl.pallas_call(
            kernel,
            out_shape=jax.ShapeDtypeStruct((num_splits, _SUB, _LANE),
                                           jnp.float32),
            grid=(num_splits, steps),
            in_specs=[in_spec, in_spec, in_spec],
            out_specs=out_spec,
            compiler_params=pltpu.CompilerParams(
                dimension_semantics=("parallel", "arbitrary"),
                vmem_limit_bytes=vmem_limit),
            cost_estimate=cost,
        )(x2d, y2d, m2d)

        # Single cross-lane/sublane reduction (scalar epilogue).
        total = total + jnp.sum(partials)

    if tail:
        # <=127-element tail folded in with plain jnp (avoids a full-array pad
        # copy in HBM for a bandwidth-bound kernel).
        xt = xf[aligned:].astype(jnp.float32)
        yt = yf[aligned:].astype(jnp.float32)
        mt = mf[aligned:].astype(jnp.float32)
        dt = mt * (xt - yt)
        total = total + jnp.sum(dt * dt)

    return jnp.sqrt(total / jnp.float32(n_elems))


if __name__ == "__main__":
    key = jax.random.PRNGKey(0)
    k1, k2, k3 = jax.random.split(key, 3)

    # Small NCHW shapes consistent with the module's forward.
    N, C, H, W = 2, 4, 16, 16
    output = jax.random.normal(k1, (N, C, H, W), dtype=jnp.float32)
    target = jax.random.normal(k2, (N, C, H, W), dtype=jnp.float32)
    # a_m is a mask; use a deterministic 0/1 mask.
    a_m = (jax.random.uniform(k3, (N, C, H, W)) > 0.5).astype(jnp.float32)

    loss = mask_loss(output, target, a_m)
    jax.block_until_ready(loss)

    # Reference check in plain JAX.
    ref = jnp.sqrt(jnp.mean(jnp.square(a_m * output - a_m * target)))
    assert jnp.allclose(loss, ref, rtol=1e-5, atol=1e-6), (loss, ref)

    print("KERNEL_OK")
</pallas_src>

<mosaic_0001>
module attributes {stable_mosaic.version = 11 : i64} {
  func.func @_mask_loss_kernel(%arg0: i32, %arg1: i32, %arg2: memref<16x128xf32, #tpu.memory_space<vmem>>, %arg3: memref<16x128xf32, #tpu.memory_space<vmem>>, %arg4: memref<16x128xf32, #tpu.memory_space<vmem>>, %arg5: memref<1x8x128xf32, #tpu.memory_space<vmem>>) attributes {dimension_semantics = [#tpu.dimension_semantics<parallel>, #tpu.dimension_semantics<arbitrary>], iteration_bounds = array<i64: 1, 1>, scalar_prefetch = 0 : i64, scratch_operands = 0 : i64, tpu.core_type = #tpu.core_type<tc>, window_params = [{transform_indices = @transform_0, window_bounds = array<i64: 16, 128>}, {transform_indices = @transform_1, window_bounds = array<i64: 16, 128>}, {transform_indices = @transform_2, window_bounds = array<i64: 16, 128>}, {transform_indices = @transform_3, window_bounds = array<i64: 1, 8, 128>}]} {
    %c0_i32 = arith.constant 0 : i32
    %0 = arith.cmpi eq, %arg1, %c0_i32 : i32
    %1 = arith.extui %0 : i1 to i32
    %c0_i32_0 = arith.constant 0 : i32
    %2 = arith.cmpi ne, %1, %c0_i32_0 : i32
    scf.if %2 {
      %cst_12 = arith.constant 0.000000e+00 : f32
      %17 = vector.broadcast %cst_12 : f32 to vector<8x128xf32>
      %c0_13 = arith.constant 0 : index
      %c0_14 = arith.constant 0 : index
      %c0_15 = arith.constant 0 : index
      %18 = vector.load %arg5[%c0_13, %c0_14, %c0_15] : memref<1x8x128xf32, #tpu.memory_space<vmem>>, vector<1x8x128xf32>
      %19 = vector.shape_cast %18 : vector<1x8x128xf32> to vector<8x128xf32>
      %20 = vector.shape_cast %17 : vector<8x128xf32> to vector<1x8x128xf32>
      tpu.vector_store %arg5[%c0_13, %c0_14, %c0_15], %20 {strides = array<i32>} : memref<1x8x128xf32, #tpu.memory_space<vmem>>, vector<1x8x128xf32>,
    } else {
    }
    %c0 = arith.constant 0 : index
    %c0_1 = arith.constant 0 : index
    %3 = vector.load %arg2[%c0, %c0_1] : memref<16x128xf32, #tpu.memory_space<vmem>>, vector<16x128xf32>
    %c0_2 = arith.constant 0 : index
    %c0_3 = arith.constant 0 : index
    %4 = vector.load %arg3[%c0_2, %c0_3] : memref<16x128xf32, #tpu.memory_space<vmem>>, vector<16x128xf32>
    %c0_4 = arith.constant 0 : index
    %c0_5 = arith.constant 0 : index
    %5 = vector.load %arg4[%c0_4, %c0_5] : memref<16x128xf32, #tpu.memory_space<vmem>>, vector<16x128xf32>
    %6 = arith.subf %3, %4 : vector<16x128xf32>
    %7 = arith.mulf %5, %6 : vector<16x128xf32>
    %8 = arith.mulf %7, %7 : vector<16x128xf32>
    %c0_6 = arith.constant 0 : index
    %c0_7 = arith.constant 0 : index
    %c0_8 = arith.constant 0 : index
    %9 = vector.load %arg5[%c0_6, %c0_7, %c0_8] : memref<1x8x128xf32, #tpu.memory_space<vmem>>, vector<1x8x128xf32>
    %10 = vector.shape_cast %9 : vector<1x8x128xf32> to vector<8x128xf32>
    %11 = vector.shape_cast %8 : vector<16x128xf32> to vector<2x8x128xf32>
    %cst = arith.constant dense<0.000000e+00> : vector<8x128xf32>
    %12 = vector.multi_reduction <add>, %11, %cst [0] : vector<2x8x128xf32> to vector<8x128xf32>
    %13 = arith.addf %10, %12 : vector<8x128xf32>
    %c0_9 = arith.constant 0 : index
    %c0_10 = arith.constant 0 : index
    %c0_11 = arith.constant 0 : index
    %14 = vector.load %arg5[%c0_9, %c0_10, %c0_11] : memref<1x8x128xf32, #tpu.memory_space<vmem>>, vector<1x8x128xf32>
    %15 = vector.shape_cast %14 : vector<1x8x128xf32> to vector<8x128xf32>
    %16 = vector.shape_cast %13 : vector<8x128xf32> to vector<1x8x128xf32>
    tpu.vector_store %arg5[%c0_9, %c0_10, %c0_11], %16 {strides = array<i32>} : memref<1x8x128xf32, #tpu.memory_space<vmem>>, vector<1x8x128xf32>,
    return
  }
  func.func @transform_0(%arg0: i32, %arg1: i32) -> (i32, i32) {
    %c1_i32 = arith.constant 1 : i32
    %0 = arith.muli %arg0, %c1_i32 : i32
    %1 = arith.addi %0, %arg1 : i32
    %c0_i32 = arith.constant 0 : i32
    %2 = arith.minsi %1, %c0_i32 : i32
    %c0_i32_0 = arith.constant 0 : i32
    %c0_i32_1 = arith.constant 0 : i32
    return %2, %c0_i32_0 : i32, i32
  }
  func.func @transform_1(%arg0: i32, %arg1: i32) -> (i32, i32) {
    %c1_i32 = arith.constant 1 : i32
    %0 = arith.muli %arg0, %c1_i32 : i32
    %1 = arith.addi %0, %arg1 : i32
    %c0_i32 = arith.constant 0 : i32
    %2 = arith.minsi %1, %c0_i32 : i32
    %c0_i32_0 = arith.constant 0 : i32
    %c0_i32_1 = arith.constant 0 : i32
    return %2, %c0_i32_0 : i32, i32
  }
  func.func @transform_2(%arg0: i32, %arg1: i32) -> (i32, i32) {
    %c1_i32 = arith.constant 1 : i32
    %0 = arith.muli %arg0, %c1_i32 : i32
    %1 = arith.addi %0, %arg1 : i32
    %c0_i32 = arith.constant 0 : i32
    %2 = arith.minsi %1, %c0_i32 : i32
    %c0_i32_0 = arith.constant 0 : i32
    %c0_i32_1 = arith.constant 0 : i32
    return %2, %c0_i32_0 : i32, i32
  }
  func.func @transform_3(%arg0: i32, %arg1: i32) -> (i32, i32, i32) {
    %c0_i32 = arith.constant 0 : i32
    %c0_i32_0 = arith.constant 0 : i32
    %c0_i32_1 = arith.constant 0 : i32
    return %arg0, %c0_i32, %c0_i32_0 : i32, i32, i32
  }
}

</mosaic_0001>

<bundles_post_ra>
// kernel: tpu_custom_call.1
= control target key start
LH: loop header
LB: loop body
LE: loop exit
PB: predicated region body
PF: predicated region fallthrough
CT: control target
= control target key end

     0   :  { %8 = vsyncpa [#allocation3], 0  ;;  %s320_s0 = inlined_call_operand.hbm [shape: f32[16,128], index: 0, kind: input, shape index: {}]   ;;  %s321_s1 = inlined_call_operand.hbm [shape: f32[16,128], index: 1, kind: input, shape index: {}]   ;;  %s322_s2 = inlined_call_operand.hbm [shape: f32[16,128], index: 2, kind: input, shape index: {}]   ;;  %s323_s3 = inlined_call_operand.hbm [shape: f32[1,8,128], index: 3, kind: output, shape index: {}]  }
   0x1   :  { %9 = vsyncpa [#allocation6], 0 }
   0x2   :  { %10 = vsyncpa [#allocation4], 0  ;;  %s230_s12 = smov [#allocation5]   ;;  %s231_s14 = smov [#allocation2]  }
   0x3   :  { %s40_s13 = sshll.u32 %s230_s12, 4  ;;  %s22_s15 = sshll.u32 %s231_s14, 4  ;;  %s41_s13 = int_to_ptr.vmem [resolvable:$true] %s40_s13  ;;  %s256_s15 = int_to_ptr.vmem [resolvable:$true] %s22_s15 }
   0x4   :  { %s136_s18 = scalar_lea.hbm %s321_s1, 256 }
   0x5   :  { %p137_p0 = scmp.ne.s32.totalorder %s321_s1, %s136_s18  ;;  %p140_p1 = scmp.lt.u32.totalorder %s136_s18, %s321_s1 }
   0x7   :  { %p142_p2 = pnand %p140_p1, %p137_p0 }
   0x9   :  { %145 = shalt.err (!%p142_p2)
}
   0xa   :  { %s146_s23 = scalar_lea.vmem %s41_s13, 256  ;;  %p151_p4 = scmp.lt.s32.totalorder %s41_s13, %s41_s13 }
   0xb   :  { %p147_p3 = scmp.ne.s32.totalorder %s41_s13, %s146_s23  ;;  %p152_p5 = scmp.lt.s32.totalorder %s146_s23, %s146_s23 }
   0xd   :  { %p153_p6 = por %p152_p5, %p151_p4 }
   0xf   :  { %p154_p7 = pnand %p153_p6, %p147_p3 }
  0x11   :  { %157 = shalt.err (!%p154_p7)
}
  0x12   :  { %s232_s24 = smov 128   ;;  %s233_s25 = smov 8  }
  0x13   :  { %46 = dma.hbm_to_vmem [thread:$0]  %s321_s1, 256, %s41_s13, [#allocation6], %s232_s24, %s232_s24, %s233_s25  }
  0x14   :  { %s158_s30 = scalar_lea.hbm %s320_s0, 256 }
  0x15   :  { %p159_p8 = scmp.ne.s32.totalorder %s320_s0, %s158_s30  ;;  %p162_p9 = scmp.lt.u32.totalorder %s158_s30, %s320_s0 }
  0x17   :  { %p164_p10 = pnand %p162_p9, %p159_p8 }
  0x19   :  { %167 = shalt.err (!%p164_p10)
}
  0x1a   :  { %s168_s8 = scalar_lea.vmem %s256_s15, 256  ;;  %p173_p12 = scmp.lt.s32.totalorder %s256_s15, %s256_s15 }
  0x1b   :  { %p169_p11 = scmp.ne.s32.totalorder %s256_s15, %s168_s8  ;;  %p174_p13 = scmp.lt.s32.totalorder %s168_s8, %s168_s8 }
  0x1d   :  { %p175_p0 = por %p174_p13, %p173_p12 }
  0x1f   :  { %p176_p1 = pnand %p175_p0, %p169_p11 }
  0x21   :  { %179 = shalt.err (!%p176_p1)
}
  0x22   :  { %28 = dma.hbm_to_vmem [thread:$0]  %s320_s0, 256, %s256_s15, [#allocation3], %s232_s24, %s232_s24, %s233_s25  }
  0x23   :  { %s234_s10 = smov [#allocation7]   ;;  %s180_s14 = scalar_lea.hbm %s322_s2, 256 }
  0x24   :  { %s58_s11 = sshll.u32 %s234_s10, 4  ;;  %p181_p2 = scmp.ne.s32.totalorder %s322_s2, %s180_s14  ;;  %s59_s11 = int_to_ptr.vmem [resolvable:$true] %s58_s11 }
  0x25   :  { %p184_p3 = scmp.lt.u32.totalorder %s180_s14, %s322_s2 }
  0x27   :  { %p186_p4 = pnand %p184_p3, %p181_p2 }
  0x29   :  { %189 = shalt.err (!%p186_p4)
}
  0x2a   :  { %s190_s20 = scalar_lea.vmem %s59_s11, 256  ;;  %p195_p6 = scmp.lt.s32.totalorder %s59_s11, %s59_s11 }
  0x2b   :  { %p191_p5 = scmp.ne.s32.totalorder %s59_s11, %s190_s20  ;;  %p196_p7 = scmp.lt.s32.totalorder %s190_s20, %s190_s20 }
  0x2d   :  { %p197_p8 = por %p196_p7, %p195_p6 }
  0x2f   :  { %p198_p9 = pnand %p197_p8, %p191_p5 }
  0x31   :  { %201 = shalt.err (!%p198_p9)
}
  0x32   :  { %64 = dma.hbm_to_vmem [thread:$0]  %s322_s2, 256, %s59_s11, [#allocation6], %s232_s24, %s232_s24, %s233_s25  }
  0x33   :  { %224 = dma.done.wait [#allocation3], 256  }
  0x34   :  { %225 = vsyncadd [#allocation3], 4294967040 }
  0x35   :  { %226 = dma.done.wait [#allocation6], 512  }
  0x36   :  { %227 = vsyncadd [#allocation6], 4294966784  ;;  %v91_v0 = vld [vmem:[#allocation2] sm:$0xff]  ;;  %v92_v1 = vld [vmem:[#allocation2 + $0x8] sm:$0xff]  ;;  %s235_s21 = smov [#allocation8]  }
  0x37   :  { %v93_v2 = vld [vmem:[#allocation5] sm:$0xff]  ;;  %v94_v3 = vld [vmem:[#allocation5 + $0x8] sm:$0xff]  ;;  %v95_v4 = vld [vmem:[#allocation7] sm:$0xff]  ;;  %s113_s22 = sshll.u32 %s235_s21, 4  ;;  %s114_s22 = int_to_ptr.vmem [resolvable:$true] %s113_s22 }
  0x38   :  { %v96_v5 = vld [vmem:[#allocation7 + $0x8] sm:$0xff]  ;;  %v97_v6 = vsub.f32 %v91_v0, %v93_v2  ;;  %v98_v7 = vsub.f32 %v92_v1, %v94_v3  ;;  %s202_s2 = scalar_lea.vmem %s114_s22, 128  ;;  %p207_p11 = scmp.lt.s32.totalorder %s114_s22, %s114_s22 }
  0x39   :  { %p203_p10 = scmp.ne.s32.totalorder %s114_s22, %s202_s2  ;;  %p208_p12 = scmp.lt.s32.totalorder %s202_s2, %s202_s2 }
  0x3a   :  { %v99_v8 = vmul.f32 %v97_v6, %v95_v4  ;;  %v100_v9 = vmul.f32 %v98_v7, %v96_v5 }
  0x3b   :  { %p209_p13 = por %p208_p12, %p207_p11 }
  0x3c   :  { %v101_v10 = vmul.f32 %v99_v8, %v99_v8  ;;  %v102_v11 = vmul.f32 %v100_v9, %v100_v9 }
  0x3d   :  { %p210_p0 = pnand %p209_p13, %p203_p10 }
  0x3e   :  { %v104_v12 = vadd.f32 %v102_v11, %v101_v10 }
  0x40   :  { %106 = vst [vmem:[#allocation8] sm:$0xff] %v104_v12 }
  0x41   :  { %213 = shalt.err (!%p210_p0)
}
  0x42   :  { %s214_s25 = scalar_lea.hbm %s323_s3, 128 }
  0x43   :  { %p215_p1 = scmp.ne.s32.totalorder %s323_s3, %s214_s25  ;;  %p218_p2 = scmp.lt.u32.totalorder %s214_s25, %s323_s3 }
  0x45   :  { %p220_p3 = pnand %p218_p2, %p215_p1 }
  0x47   :  { %223 = shalt.err (!%p220_p3)
}
  0x48   :  { %116 = dma.vmem_to_hbm [thread:$0]  %s114_s22, 128, %s323_s3, [#allocation4]  }
  0x49   :  { %228 = dma.done.wait [#allocation4], 128  }
  0x4a   :  { %229 = vsyncadd [#allocation4], 4294967168 }
  0x4b   :  { %120 = vsyncpa [#allocation3], 1 }
  0x4c   :  { %121 = vsyncpa [#allocation6], 1 }
  0x4d   :  { %122 = vsyncpa [#allocation4], 1 }

</bundles_post_ra>
